<compile_context>
chip_gen: v7x
topology: tpu7x:2x2x1
jax: 0.10.0
libtpu: 0.0.40
codegen_flags: <defaults>
</compile_context>

<pallas_src>
import functools
from typing import NamedTuple, Tuple

import jax
import jax.numpy as jnp
from jax.experimental import pallas as pl
from jax.experimental.pallas import tpu as pltpu

# ----------------------------------------------------------------------------
# Tiling constants (lane-dense, conservative VMEM footprint on all chips).
# ----------------------------------------------------------------------------
_TB_MAX = 256   # batch tile (multiple of 8)
_TN_MAX = 512   # output-feature tile (multiple of 128 -> unmasked vst)
_TK_MAX = 512   # contraction tile (multiple of 128)


def _round_up(n: int, m: int) -> int:
    return ((n + m - 1) // m) * m


def _pad_batch_dim(b: int) -> int:
    bp = _round_up(b, 8)
    return bp if bp <= _TB_MAX else _round_up(bp, _TB_MAX)


def _pad_feat_dim(n: int) -> int:
    np_ = _round_up(n, 128)
    return np_ if np_ <= _TN_MAX else _round_up(np_, _TN_MAX)


def _pad2d(a, rows, cols):
    return jnp.pad(a, ((0, rows - a.shape[0]), (0, cols - a.shape[1])))


# ----------------------------------------------------------------------------
# Kernels
# ----------------------------------------------------------------------------
def _make_linear_kernel(has_bias: bool, activation: str):
    """Tiled matmul with f32 VMEM accumulator; optional bias + ReLU epilogue."""

    def kernel(*refs):
        if has_bias:
            x_ref, w_ref, b_ref, o_ref, acc_ref = refs
        else:
            x_ref, w_ref, o_ref, acc_ref = refs
            b_ref = None

        k = pl.program_id(2)

        @pl.when(k == 0)
        def _():
            acc_ref[...] = jnp.zeros_like(acc_ref)

        acc_ref[...] += jnp.dot(
            x_ref[...], w_ref[...], preferred_element_type=jnp.float32)

        @pl.when(k == pl.num_programs(2) - 1)
        def _():
            acc = acc_ref[...]
            if has_bias:
                acc = acc + b_ref[...].astype(jnp.float32)
            if activation == "relu":
                acc = jnp.maximum(acc, 0.0)
            o_ref[...] = acc.astype(o_ref.dtype)

    return kernel


def _ln_relu_kernel(x_ref, o_ref, *, n_valid: int, eps: float):
    """LayerNorm (no affine, biased var, torch eps) + ReLU; masks padded lanes."""
    x = x_ref[...].astype(jnp.float32)
    lane = jax.lax.broadcasted_iota(jnp.int32, x.shape, 1)
    valid = lane < n_valid
    n = jnp.float32(n_valid)
    xm = jnp.where(valid, x, 0.0)
    mean = jnp.sum(xm, axis=-1, keepdims=True) / n
    d = jnp.where(valid, x - mean, 0.0)
    var = jnp.sum(d * d, axis=-1, keepdims=True) / n
    y = d * jax.lax.rsqrt(var + eps)
    # Fused ReLU; padded lanes stay exactly 0 for the next (zero-padded) matmul.
    o_ref[...] = jnp.maximum(y, 0.0).astype(o_ref.dtype)


def _softmax_kernel(x_ref, o_ref, *, n_valid: int):
    """Row softmax over the valid feature lanes; padded lanes output 0."""
    x = x_ref[...].astype(jnp.float32)
    lane = jax.lax.broadcasted_iota(jnp.int32, x.shape, 1)
    valid = lane < n_valid
    m = jnp.max(jnp.where(valid, x, -jnp.inf), axis=-1, keepdims=True)
    e = jnp.where(valid, jnp.exp(x - m), 0.0)
    s = jnp.sum(e, axis=-1, keepdims=True)
    o_ref[...] = (e / s).astype(o_ref.dtype)


# ----------------------------------------------------------------------------
# pallas_call wrappers
# ----------------------------------------------------------------------------
def fused_linear(x, w, b=None, *, activation="none"):
    """y = x @ w (+ b) (+ relu). x:(Bp,Kp), w:(Kp,Np), b:(1,Np). Dims pre-padded."""
    bp, kp = x.shape
    kp2, np_ = w.shape
    assert kp == kp2, (kp, kp2)
    tb = bp if bp <= _TB_MAX else _TB_MAX
    tn = np_ if np_ <= _TN_MAX else _TN_MAX
    tk = kp if kp <= _TK_MAX else _TK_MAX
    assert bp % tb == 0 and np_ % tn == 0 and kp % tk == 0

    has_bias = b is not None
    in_specs = [
        pl.BlockSpec((tb, tk), lambda i, j, k: (i, k)),
        pl.BlockSpec((tk, tn), lambda i, j, k: (k, j)),
    ]
    operands = [x, w]
    if has_bias:
        in_specs.append(pl.BlockSpec((1, tn), lambda i, j, k: (0, j)))
        operands.append(b)

    flops = 2 * bp * kp * np_
    bytes_accessed = 4 * (bp * kp + kp * np_ + bp * np_ + (np_ if has_bias else 0))

    return pl.pallas_call(
        _make_linear_kernel(has_bias, activation),
        out_shape=jax.ShapeDtypeStruct((bp, np_), x.dtype),
        grid_spec=pltpu.PrefetchScalarGridSpec(
            num_scalar_prefetch=0,
            grid=(bp // tb, np_ // tn, kp // tk),
            in_specs=in_specs,
            out_specs=pl.BlockSpec((tb, tn), lambda i, j, k: (i, j)),
            scratch_shapes=[pltpu.VMEM((tb, tn), jnp.float32)],
        ),
        compiler_params=pltpu.CompilerParams(
            dimension_semantics=("parallel", "parallel", "arbitrary")),
        cost_estimate=pl.CostEstimate(
            flops=flops, transcendentals=0, bytes_accessed=bytes_accessed),
    )(*operands)


def _rowwise_call(kernel, x):
    bp, np_ = x.shape
    tb = bp if bp <= _TB_MAX else _TB_MAX
    assert bp % tb == 0
    return pl.pallas_call(
        kernel,
        out_shape=jax.ShapeDtypeStruct((bp, np_), x.dtype),
        grid_spec=pltpu.PrefetchScalarGridSpec(
            num_scalar_prefetch=0,
            grid=(bp // tb,),
            in_specs=[pl.BlockSpec((tb, np_), lambda i: (i, 0))],
            out_specs=pl.BlockSpec((tb, np_), lambda i: (i, 0)),
        ),
        compiler_params=pltpu.CompilerParams(dimension_semantics=("parallel",)),
    )(x)


def layer_norm_relu(x, *, n_valid, eps=1e-5):
    return _rowwise_call(
        functools.partial(_ln_relu_kernel, n_valid=n_valid, eps=eps), x)


def masked_softmax(x, *, n_valid):
    return _rowwise_call(functools.partial(_softmax_kernel, n_valid=n_valid), x)


# ----------------------------------------------------------------------------
# Decoder: params + forward
# ----------------------------------------------------------------------------
class DecoderConfig(NamedTuple):
    latent_dim: int
    embedding_dim: int            # n_cond of the first CondLayers (0 => plain Linear)
    layer_sizes: Tuple[int, ...]  # hidden sizes + output x_dim, as in the torch module
    recon_loss: str               # "mse" | "nb" | "zinb"
    use_ln: bool = True           # LayerNorm(elementwise_affine=False) after linears
    # TODO(synk): use_bn (BatchNorm1d) and use_dr (Dropout) are not implemented; demo
    # config corresponds to use_bn=False, use_dr=False (dropout is identity at inference).


def _torch_linear_init(key, n_out, n_in, with_bias):
    """nn.Linear default init: U(-1/sqrt(fan_in), 1/sqrt(fan_in))."""
    kw, kb = jax.random.split(key)
    bound = 1.0 / jnp.sqrt(jnp.float32(n_in))
    w = jax.random.uniform(kw, (n_out, n_in), jnp.float32, -bound, bound)
    if not with_bias:
        return w, None
    b = jax.random.uniform(kb, (n_out,), jnp.float32, -bound, bound)
    return w, b


def init_decoder_params(key, cfg: DecoderConfig):
    """Raw params in PyTorch (n_out, n_in) layout — used by the pure-JAX reference."""
    sizes = (cfg.latent_dim,) + tuple(cfg.layer_sizes)
    keys = list(jax.random.split(key, 8 + len(sizes)))
    raw = {}
    raw["first_expr_w"], _ = _torch_linear_init(keys.pop(), sizes[1], cfg.latent_dim, False)
    if cfg.embedding_dim > 0:
        raw["first_cond_w"], _ = _torch_linear_init(
            keys.pop(), sizes[1], cfg.embedding_dim, False)
    hidden = []
    for i, (din, dout) in enumerate(zip(sizes[1:-1], sizes[2:])):
        if i + 3 < len(sizes):       # same construction rule as the torch module
            w, _ = _torch_linear_init(keys.pop(), dout, din, False)
            hidden.append(w)
    raw["hidden_ws"] = tuple(hidden)
    if cfg.recon_loss == "mse":
        raw["out_w"], raw["out_b"] = _torch_linear_init(keys.pop(), sizes[-1], sizes[-2], True)
    elif cfg.recon_loss in ("nb", "zinb"):
        raw["mean_w"], raw["mean_b"] = _torch_linear_init(keys.pop(), sizes[-1], sizes[-2], True)
        if cfg.recon_loss == "zinb":
            raw["drop_w"], raw["drop_b"] = _torch_linear_init(
                keys.pop(), sizes[-1], sizes[-2], True)
    else:
        raise ValueError(cfg.recon_loss)
    return raw


def prep_decoder_params(raw, cfg: DecoderConfig):
    """One-time prep: fold the cond weight into the expr weight, pre-transpose to
    (K, N) and zero-pad to lane-dense tile multiples. Runs OUTSIDE the jitted
    forward, so no per-call HBM transposes / copies."""
    sizes = (cfg.latent_dim,) + tuple(cfg.layer_sizes)
    k0 = cfg.latent_dim + cfg.embedding_dim

    w_full = raw["first_expr_w"].T                                   # (latent, h1)
    if cfg.embedding_dim > 0:
        w_full = jnp.concatenate([w_full, raw["first_cond_w"].T], axis=0)  # (latent+emb, h1)
    p = {"W0": _pad2d(w_full, _pad_feat_dim(k0), _pad_feat_dim(sizes[1]))}

    hidden = []
    for j, w in enumerate(raw["hidden_ws"]):                         # w: (sizes[j+2], sizes[j+1])
        din, dout = sizes[j + 1], sizes[j + 2]
        hidden.append(_pad2d(w.T, _pad_feat_dim(din), _pad_feat_dim(dout)))
    p["hidden"] = tuple(hidden)

    def _head(wkey, bkey):
        w = _pad2d(raw[wkey].T, _pad_feat_dim(sizes[-2]), _pad_feat_dim(sizes[-1]))
        b = _pad2d(raw[bkey].reshape(1, -1), 1, _pad_feat_dim(sizes[-1]))
        return w, b

    if cfg.recon_loss == "mse":
        p["out_w"], p["out_b"] = _head("out_w", "out_b")
    else:
        p["mean_w"], p["mean_b"] = _head("mean_w", "mean_b")
        if cfg.recon_loss == "zinb":
            p["drop_w"], p["drop_b"] = _head("drop_w", "drop_b")
    return p


@functools.partial(jax.jit, static_argnames=("cfg",))
def decoder_forward(z, batch, params, cfg: DecoderConfig):
    sizes = (cfg.latent_dim,) + tuple(cfg.layer_sizes)
    b = z.shape[0]
    bp = _pad_batch_dim(b)

    # CondLayers expr/cond split is folded into one matmul against the pre-concatenated
    # weight: feed the UNSPLIT [z, batch] activation directly (no wrapper slices of x).
    x = jnp.concatenate([z, batch], axis=-1) if cfg.embedding_dim > 0 else z
    k0 = cfg.latent_dim + cfg.embedding_dim
    x = _pad2d(x, bp, _pad_feat_dim(k0))

    # FirstL: CondLayers (bias=False) [+ LN] + ReLU (ReLU fused into the matmul when no LN).
    h = fused_linear(x, params["W0"], None,
                     activation="none" if cfg.use_ln else "relu")
    if cfg.use_ln:
        h = layer_norm_relu(h, n_valid=sizes[1])
    dec_latent = h

    # HiddenL: Linear(bias=False) [+ LN] + ReLU.
    for j, w in enumerate(params["hidden"]):
        h = fused_linear(h, w, None, activation="none" if cfg.use_ln else "relu")
        if cfg.use_ln:
            h = layer_norm_relu(h, n_valid=sizes[j + 2])

    dec_latent_out = dec_latent[:b, : sizes[1]]
    n_out = sizes[-1]

    if cfg.recon_loss == "mse":
        recon = fused_linear(h, params["out_w"], params["out_b"], activation="relu")
        return recon[:b, :n_out], dec_latent_out
    if cfg.recon_loss == "nb":
        mean = fused_linear(h, params["mean_w"], params["mean_b"], activation="none")
        mean = masked_softmax(mean, n_valid=n_out)
        return mean[:b, :n_out], dec_latent_out
    if cfg.recon_loss == "zinb":
        mean = fused_linear(h, params["mean_w"], params["mean_b"], activation="none")
        mean = masked_softmax(mean, n_valid=n_out)
        drop = fused_linear(h, params["drop_w"], params["drop_b"], activation="none")
        return mean[:b, :n_out], drop[:b, :n_out], dec_latent_out
    raise ValueError(cfg.recon_loss)


# ----------------------------------------------------------------------------
# Pure-JAX reference (mirrors the PyTorch module exactly)
# ----------------------------------------------------------------------------
def reference_decoder(z, batch, raw, cfg: DecoderConfig):
    hp = jax.lax.Precision.HIGHEST
    if cfg.embedding_dim > 0:
        x = jnp.concatenate([z, batch], axis=-1)
        expr, cond = x[:, : cfg.latent_dim], x[:, cfg.latent_dim:]
        h = (jnp.dot(expr, raw["first_expr_w"].T, precision=hp)
             + jnp.dot(cond, raw["first_cond_w"].T, precision=hp))
    else:
        h = jnp.dot(z, raw["first_expr_w"].T, precision=hp)

    def norm_act(v):
        if cfg.use_ln:
            mu = v.mean(-1, keepdims=True)
            var = ((v - mu) ** 2).mean(-1, keepdims=True)
            v = (v - mu) / jnp.sqrt(var + 1e-5)
        return jnp.maximum(v, 0.0)

    h = norm_act(h)
    dec_latent = h
    for w in raw["hidden_ws"]:
        h = norm_act(jnp.dot(h, w.T, precision=hp))

    if cfg.recon_loss == "mse":
        r = jnp.maximum(jnp.dot(h, raw["out_w"].T, precision=hp) + raw["out_b"], 0.0)
        return r, dec_latent
    mean = jax.nn.softmax(
        jnp.dot(h, raw["mean_w"].T, precision=hp) + raw["mean_b"], axis=-1)
    if cfg.recon_loss == "nb":
        return mean, dec_latent
    drop = jnp.dot(h, raw["drop_w"].T, precision=hp) + raw["drop_b"]
    return mean, drop, dec_latent


# ----------------------------------------------------------------------------
# Demo / correctness check
# ----------------------------------------------------------------------------
if __name__ == "__main__":
    key = jax.random.PRNGKey(0)
    k_z, k_b, k_p1, k_p2 = jax.random.split(key, 4)

    # --- Config 1: conditional 'nb' decoder (scPoli default head) ---
    cfg1 = DecoderConfig(latent_dim=32, embedding_dim=10,
                         layer_sizes=(64, 128, 256), recon_loss="nb", use_ln=True)
    B = 16
    z = jax.random.normal(k_z, (B, cfg1.latent_dim), jnp.float32)
    batch_emb = jax.random.normal(k_b, (B, cfg1.embedding_dim), jnp.float32)

    raw1 = init_decoder_params(k_p1, cfg1)
    params1 = prep_decoder_params(raw1, cfg1)

    mean, dec_latent = jax.block_until_ready(
        decoder_forward(z, batch_emb, params1, cfg1))
    ref_mean, ref_latent = reference_decoder(z, batch_emb, raw1, cfg1)
    assert mean.shape == (B, cfg1.layer_sizes[-1])
    assert dec_latent.shape == (B, cfg1.layer_sizes[0])
    assert jnp.allclose(mean, ref_mean, atol=1e-5, rtol=1e-3), \
        float(jnp.max(jnp.abs(mean - ref_mean)))
    assert jnp.allclose(dec_latent, ref_latent, atol=1e-4, rtol=1e-4)

    # --- Config 2: unconditional 'mse' decoder (n_cond == 0, non-128-multiple x_dim) ---
    cfg2 = DecoderConfig(latent_dim=32, embedding_dim=0,
                         layer_sizes=(64, 100), recon_loss="mse", use_ln=True)
    raw2 = init_decoder_params(k_p2, cfg2)
    params2 = prep_decoder_params(raw2, cfg2)

    recon, dec_latent2 = jax.block_until_ready(
        decoder_forward(z, None, params2, cfg2))
    ref_recon, ref_latent2 = reference_decoder(z, None, raw2, cfg2)
    assert recon.shape == (B, 100)
    assert jnp.allclose(recon, ref_recon, atol=1e-4, rtol=1e-4)
    assert jnp.allclose(dec_latent2, ref_latent2, atol=1e-4, rtol=1e-4)

    print("KERNEL_OK")
</pallas_src>

<mosaic_0001>
module attributes {stable_mosaic.version = 11 : i64} {
  func.func @_ln_relu_kernel(%arg0: i32, %arg1: memref<16x128xf32, #tpu.memory_space<vmem>>, %arg2: memref<16x128xf32, #tpu.memory_space<vmem>>) attributes {dimension_semantics = [#tpu.dimension_semantics<parallel>], iteration_bounds = array<i64: 1>, scalar_prefetch = 0 : i64, scratch_operands = 0 : i64, tpu.core_type = #tpu.core_type<tc>, window_params = [{transform_indices = @transform_0, window_bounds = array<i64: 16, 128>}, {transform_indices = @transform_1, window_bounds = array<i64: 16, 128>}]} {
    %c0 = arith.constant 0 : index
    %c0_0 = arith.constant 0 : index
    %0 = vector.load %arg1[%c0, %c0_0] : memref<16x128xf32, #tpu.memory_space<vmem>>, vector<16x128xf32>
    %1 = tpu.iota {dimensions = array<i32: 1>} : vector<16x128xi32>
    %c64_i32 = arith.constant 64 : i32
    %2 = vector.broadcast %c64_i32 : i32 to vector<16x128xi32>
    %3 = arith.cmpi slt, %1, %2 : vector<16x128xi32>
    %cst = arith.constant 0.000000e+00 : f32
    %4 = vector.broadcast %cst : f32 to vector<16x128xf32>
    %5 = arith.select %3, %0, %4 : vector<16x128xi1>, vector<16x128xf32>
    %cst_1 = arith.constant dense<0.000000e+00> : vector<16xf32>
    %6 = vector.multi_reduction <add>, %5, %cst_1 [1] : vector<16x128xf32> to vector<16xf32>
    %7 = vector.shape_cast %6 : vector<16xf32> to vector<16x1xf32>
    %cst_2 = arith.constant 6.400000e+01 : f32
    %8 = vector.broadcast %cst_2 : f32 to vector<16x1xf32>
    %9 = arith.divf %7, %8 : vector<16x1xf32>
    %10 = vector.broadcast %9 : vector<16x1xf32> to vector<16x128xf32>
    %11 = arith.subf %0, %10 : vector<16x128xf32>
    %cst_3 = arith.constant 0.000000e+00 : f32
    %12 = vector.broadcast %cst_3 : f32 to vector<16x128xf32>
    %13 = arith.select %3, %11, %12 : vector<16x128xi1>, vector<16x128xf32>
    %14 = arith.mulf %13, %13 : vector<16x128xf32>
    %cst_4 = arith.constant dense<0.000000e+00> : vector<16xf32>
    %15 = vector.multi_reduction <add>, %14, %cst_4 [1] : vector<16x128xf32> to vector<16xf32>
    %16 = vector.shape_cast %15 : vector<16xf32> to vector<16x1xf32>
    %cst_5 = arith.constant 6.400000e+01 : f32
    %17 = vector.broadcast %cst_5 : f32 to vector<16x1xf32>
    %18 = arith.divf %16, %17 : vector<16x1xf32>
    %cst_6 = arith.constant 9.99999974E-6 : f32
    %19 = vector.broadcast %cst_6 : f32 to vector<16x1xf32>
    %20 = arith.addf %18, %19 : vector<16x1xf32>
    %21 = math.rsqrt %20 : vector<16x1xf32>
    %22 = vector.broadcast %21 : vector<16x1xf32> to vector<16x128xf32>
    %23 = arith.mulf %13, %22 : vector<16x128xf32>
    %cst_7 = arith.constant 0.000000e+00 : f32
    %24 = vector.broadcast %cst_7 : f32 to vector<16x128xf32>
    %25 = arith.maximumf %23, %24 : vector<16x128xf32>
    %c0_8 = arith.constant 0 : index
    %c0_9 = arith.constant 0 : index
    %26 = vector.load %arg2[%c0_8, %c0_9] : memref<16x128xf32, #tpu.memory_space<vmem>>, vector<16x128xf32>
    tpu.vector_store %arg2[%c0_8, %c0_9], %25 {strides = array<i32>} : memref<16x128xf32, #tpu.memory_space<vmem>>, vector<16x128xf32>,
    return
  }
  func.func @transform_0(%arg0: i32) -> (i32, i32) {
    %c0_i32 = arith.constant 0 : i32
    %c0_i32_0 = arith.constant 0 : i32
    return %arg0, %c0_i32 : i32, i32
  }
  func.func @transform_1(%arg0: i32) -> (i32, i32) {
    %c0_i32 = arith.constant 0 : i32
    %c0_i32_0 = arith.constant 0 : i32
    return %arg0, %c0_i32 : i32, i32
  }
}

module attributes {stable_mosaic.version = 11 : i64} {
  func.func @_ln_relu_kernel(%arg0: i32, %arg1: memref<16x128xf32, #tpu.memory_space<vmem>>, %arg2: memref<16x128xf32, #tpu.memory_space<vmem>>) attributes {dimension_semantics = [#tpu.dimension_semantics<parallel>], iteration_bounds = array<i64: 1>, scalar_prefetch = 0 : i64, scratch_operands = 0 : i64, tpu.core_type = #tpu.core_type<tc>, window_params = [{transform_indices = @transform_0, window_bounds = array<i64: 16, 128>}, {transform_indices = @transform_1, window_bounds = array<i64: 16, 128>}]} {
    %c0 = arith.constant 0 : index
    %c0_0 = arith.constant 0 : index
    %0 = vector.load %arg1[%c0, %c0_0] : memref<16x128xf32, #tpu.memory_space<vmem>>, vector<16x128xf32>
    %1 = tpu.iota {dimensions = array<i32: 1>} : vector<16x128xi32>
    %c128_i32 = arith.constant 128 : i32
    %2 = vector.broadcast %c128_i32 : i32 to vector<16x128xi32>
    %3 = arith.cmpi slt, %1, %2 : vector<16x128xi32>
    %cst = arith.constant 0.000000e+00 : f32
    %4 = vector.broadcast %cst : f32 to vector<16x128xf32>
    %5 = arith.select %3, %0, %4 : vector<16x128xi1>, vector<16x128xf32>
    %cst_1 = arith.constant dense<0.000000e+00> : vector<16xf32>
    %6 = vector.multi_reduction <add>, %5, %cst_1 [1] : vector<16x128xf32> to vector<16xf32>
    %7 = vector.shape_cast %6 : vector<16xf32> to vector<16x1xf32>
    %cst_2 = arith.constant 1.280000e+02 : f32
    %8 = vector.broadcast %cst_2 : f32 to vector<16x1xf32>
    %9 = arith.divf %7, %8 : vector<16x1xf32>
    %10 = vector.broadcast %9 : vector<16x1xf32> to vector<16x128xf32>
    %11 = arith.subf %0, %10 : vector<16x128xf32>
    %cst_3 = arith.constant 0.000000e+00 : f32
    %12 = vector.broadcast %cst_3 : f32 to vector<16x128xf32>
    %13 = arith.select %3, %11, %12 : vector<16x128xi1>, vector<16x128xf32>
    %14 = arith.mulf %13, %13 : vector<16x128xf32>
    %cst_4 = arith.constant dense<0.000000e+00> : vector<16xf32>
    %15 = vector.multi_reduction <add>, %14, %cst_4 [1] : vector<16x128xf32> to vector<16xf32>
    %16 = vector.shape_cast %15 : vector<16xf32> to vector<16x1xf32>
    %cst_5 = arith.constant 1.280000e+02 : f32
    %17 = vector.broadcast %cst_5 : f32 to vector<16x1xf32>
    %18 = arith.divf %16, %17 : vector<16x1xf32>
    %cst_6 = arith.constant 9.99999974E-6 : f32
    %19 = vector.broadcast %cst_6 : f32 to vector<16x1xf32>
    %20 = arith.addf %18, %19 : vector<16x1xf32>
    %21 = math.rsqrt %20 : vector<16x1xf32>
    %22 = vector.broadcast %21 : vector<16x1xf32> to vector<16x128xf32>
    %23 = arith.mulf %13, %22 : vector<16x128xf32>
    %cst_7 = arith.constant 0.000000e+00 : f32
    %24 = vector.broadcast %cst_7 : f32 to vector<16x128xf32>
    %25 = arith.maximumf %23, %24 : vector<16x128xf32>
    %c0_8 = arith.constant 0 : index
    %c0_9 = arith.constant 0 : index
    %26 = vector.load %arg2[%c0_8, %c0_9] : memref<16x128xf32, #tpu.memory_space<vmem>>, vector<16x128xf32>
    tpu.vector_store %arg2[%c0_8, %c0_9], %25 {strides = array<i32>} : memref<16x128xf32, #tpu.memory_space<vmem>>, vector<16x128xf32>,
    return
  }
  func.func @transform_0(%arg0: i32) -> (i32, i32) {
    %c0_i32 = arith.constant 0 : i32
    %c0_i32_0 = arith.constant 0 : i32
    return %arg0, %c0_i32 : i32, i32
  }
  func.func @transform_1(%arg0: i32) -> (i32, i32) {
    %c0_i32 = arith.constant 0 : i32
    %c0_i32_0 = arith.constant 0 : i32
    return %arg0, %c0_i32 : i32, i32
  }
}

module attributes {stable_mosaic.version = 11 : i64} {
  func.func @kernel(%arg0: i32, %arg1: i32, %arg2: i32, %arg3: memref<16x128xf32, #tpu.memory_space<vmem>>, %arg4: memref<128x128xf32, #tpu.memory_space<vmem>>, %arg5: memref<16x128xf32, #tpu.memory_space<vmem>>, %arg6: memref<16x128xf32, #tpu.memory_space<vmem>>) attributes {dimension_semantics = [#tpu.dimension_semantics<parallel>, #tpu.dimension_semantics<parallel>, #tpu.dimension_semantics<arbitrary>], iteration_bounds = array<i64: 1, 1, 1>, scalar_prefetch = 0 : i64, scratch_operands = 1 : i64, tpu.core_type = #tpu.core_type<tc>, window_params = [{transform_indices = @transform_0, window_bounds = array<i64: 16, 128>}, {transform_indices = @transform_1, window_bounds = array<i64: 128, 128>}, {transform_indices = @transform_2, window_bounds = array<i64: 16, 128>}]} {
    %c0_i32 = arith.constant 0 : i32
    %0 = arith.cmpi eq, %arg2, %c0_i32 : i32
    %1 = arith.extui %0 : i1 to i32
    %c0_i32_0 = arith.constant 0 : i32
    %2 = arith.cmpi ne, %1, %c0_i32_0 : i32
    scf.if %2 {
      %cst_10 = arith.constant 0.000000e+00 : f32
      %12 = vector.broadcast %cst_10 : f32 to vector<16x128xf32>
      %c0_11 = arith.constant 0 : index
      %c0_12 = arith.constant 0 : index
      %13 = vector.load %arg6[%c0_11, %c0_12] : memref<16x128xf32, #tpu.memory_space<vmem>>, vector<16x128xf32>
      tpu.vector_store %arg6[%c0_11, %c0_12], %12 {strides = array<i32>} : memref<16x128xf32, #tpu.memory_space<vmem>>, vector<16x128xf32>,
    } else {
    }
    %c0 = arith.constant 0 : index
    %c0_1 = arith.constant 0 : index
    %3 = vector.load %arg6[%c0, %c0_1] : memref<16x128xf32, #tpu.memory_space<vmem>>, vector<16x128xf32>
    %c0_2 = arith.constant 0 : index
    %c0_3 = arith.constant 0 : index
    %4 = vector.load %arg3[%c0_2, %c0_3] : memref<16x128xf32, #tpu.memory_space<vmem>>, vector<16x128xf32>
    %c0_4 = arith.constant 0 : index
    %c0_5 = arith.constant 0 : index
    %5 = vector.load %arg4[%c0_4, %c0_5] : memref<128x128xf32, #tpu.memory_space<vmem>>, vector<128x128xf32>
    %cst = arith.constant dense<0.000000e+00> : vector<16x128xf32>
    %6 = tpu.matmul %4, %5, %cst {dimension_numbers = #tpu.dot_dimension_numbers<[1], [0], [0], [1], [0, 0, 1, 1], [], []>} : vector<16x128xf32>, vector<128x128xf32>, vector<16x128xf32> -> vector<16x128xf32>
    %7 = arith.addf %3, %6 : vector<16x128xf32>
    %c0_6 = arith.constant 0 : index
    %c0_7 = arith.constant 0 : index
    %8 = vector.load %arg6[%c0_6, %c0_7] : memref<16x128xf32, #tpu.memory_space<vmem>>, vector<16x128xf32>
    tpu.vector_store %arg6[%c0_6, %c0_7], %7 {strides = array<i32>} : memref<16x128xf32, #tpu.memory_space<vmem>>, vector<16x128xf32>,
    %c0_i32_8 = arith.constant 0 : i32
    %9 = arith.cmpi eq, %arg2, %c0_i32_8 : i32
    %10 = arith.extui %9 : i1 to i32
    %c0_i32_9 = arith.constant 0 : i32
    %11 = arith.cmpi ne, %10, %c0_i32_9 : i32
    scf.if %11 {
      %c0_10 = arith.constant 0 : index
      %c0_11 = arith.constant 0 : index
      %12 = vector.load %arg6[%c0_10, %c0_11] : memref<16x128xf32, #tpu.memory_space<vmem>>, vector<16x128xf32>
      %c0_12 = arith.constant 0 : index
      %c0_13 = arith.constant 0 : index
      %13 = vector.load %arg5[%c0_12, %c0_13] : memref<16x128xf32, #tpu.memory_space<vmem>>, vector<16x128xf32>
      tpu.vector_store %arg5[%c0_12, %c0_13], %12 {strides = array<i32>} : memref<16x128xf32, #tpu.memory_space<vmem>>, vector<16x128xf32>,
    } else {
    }
    return
  }
  func.func @transform_0(%arg0: i32, %arg1: i32, %arg2: i32) -> (i32, i32) {
    %c0_i32 = arith.constant 0 : i32
    return %arg0, %arg2 : i32, i32
  }
  func.func @transform_1(%arg0: i32, %arg1: i32, %arg2: i32) -> (i32, i32) {
    %c0_i32 = arith.constant 0 : i32
    return %arg2, %arg1 : i32, i32
  }
  func.func @transform_2(%arg0: i32, %arg1: i32, %arg2: i32) -> (i32, i32) {
    %c0_i32 = arith.constant 0 : i32
    return %arg0, %arg1 : i32, i32
  }
}

module attributes {stable_mosaic.version = 11 : i64} {
  func.func @kernel(%arg0: i32, %arg1: i32, %arg2: i32, %arg3: memref<16x128xf32, #tpu.memory_space<vmem>>, %arg4: memref<128x256xf32, #tpu.memory_space<vmem>>, %arg5: memref<1x256xf32, #tpu.memory_space<vmem>>, %arg6: memref<16x256xf32, #tpu.memory_space<vmem>>, %arg7: memref<16x256xf32, #tpu.memory_space<vmem>>) attributes {dimension_semantics = [#tpu.dimension_semantics<parallel>, #tpu.dimension_semantics<parallel>, #tpu.dimension_semantics<arbitrary>], iteration_bounds = array<i64: 1, 1, 1>, scalar_prefetch = 0 : i64, scratch_operands = 1 : i64, tpu.core_type = #tpu.core_type<tc>, window_params = [{transform_indices = @transform_0, window_bounds = array<i64: 16, 128>}, {transform_indices = @transform_1, window_bounds = array<i64: 128, 256>}, {transform_indices = @transform_2, window_bounds = array<i64: 1, 256>}, {transform_indices = @transform_3, window_bounds = array<i64: 16, 256>}]} {
    %c0_i32 = arith.constant 0 : i32
    %0 = arith.cmpi eq, %arg2, %c0_i32 : i32
    %1 = arith.extui %0 : i1 to i32
    %c0_i32_0 = arith.constant 0 : i32
    %2 = arith.cmpi ne, %1, %c0_i32_0 : i32
    scf.if %2 {
      %cst_10 = arith.constant 0.000000e+00 : f32
      %12 = vector.broadcast %cst_10 : f32 to vector<16x256xf32>
      %c0_11 = arith.constant 0 : index
      %c0_12 = arith.constant 0 : index
      %13 = vector.load %arg7[%c0_11, %c0_12] : memref<16x256xf32, #tpu.memory_space<vmem>>, vector<16x256xf32>
      tpu.vector_store %arg7[%c0_11, %c0_12], %12 {strides = array<i32>} : memref<16x256xf32, #tpu.memory_space<vmem>>, vector<16x256xf32>,
    } else {
    }
    %c0 = arith.constant 0 : index
    %c0_1 = arith.constant 0 : index
    %3 = vector.load %arg7[%c0, %c0_1] : memref<16x256xf32, #tpu.memory_space<vmem>>, vector<16x256xf32>
    %c0_2 = arith.constant 0 : index
    %c0_3 = arith.constant 0 : index
    %4 = vector.load %arg3[%c0_2, %c0_3] : memref<16x128xf32, #tpu.memory_space<vmem>>, vector<16x128xf32>
    %c0_4 = arith.constant 0 : index
    %c0_5 = arith.constant 0 : index
    %5 = vector.load %arg4[%c0_4, %c0_5] : memref<128x256xf32, #tpu.memory_space<vmem>>, vector<128x256xf32>
    %cst = arith.constant dense<0.000000e+00> : vector<16x256xf32>
    %6 = tpu.matmul %4, %5, %cst {dimension_numbers = #tpu.dot_dimension_numbers<[1], [0], [0], [1], [0, 0, 1, 1], [], []>} : vector<16x128xf32>, vector<128x256xf32>, vector<16x256xf32> -> vector<16x256xf32>
    %7 = arith.addf %3, %6 : vector<16x256xf32>
    %c0_6 = arith.constant 0 : index
    %c0_7 = arith.constant 0 : index
    %8 = vector.load %arg7[%c0_6, %c0_7] : memref<16x256xf32, #tpu.memory_space<vmem>>, vector<16x256xf32>
    tpu.vector_store %arg7[%c0_6, %c0_7], %7 {strides = array<i32>} : memref<16x256xf32, #tpu.memory_space<vmem>>, vector<16x256xf32>,
    %c0_i32_8 = arith.constant 0 : i32
    %9 = arith.cmpi eq, %arg2, %c0_i32_8 : i32
    %10 = arith.extui %9 : i1 to i32
    %c0_i32_9 = arith.constant 0 : i32
    %11 = arith.cmpi ne, %10, %c0_i32_9 : i32
    scf.if %11 {
      %c0_10 = arith.constant 0 : index
      %c0_11 = arith.constant 0 : index
      %12 = vector.load %arg7[%c0_10, %c0_11] : memref<16x256xf32, #tpu.memory_space<vmem>>, vector<16x256xf32>
      %c0_12 = arith.constant 0 : index
      %c0_13 = arith.constant 0 : index
      %13 = vector.load %arg5[%c0_12, %c0_13] : memref<1x256xf32, #tpu.memory_space<vmem>>, vector<1x256xf32>
      %14 = vector.broadcast %13 : vector<1x256xf32> to vector<16x256xf32>
      %15 = arith.addf %12, %14 : vector<16x256xf32>
      %c0_14 = arith.constant 0 : index
      %c0_15 = arith.constant 0 : index
      %16 = vector.load %arg6[%c0_14, %c0_15] : memref<16x256xf32, #tpu.memory_space<vmem>>, vector<16x256xf32>
      tpu.vector_store %arg6[%c0_14, %c0_15], %15 {strides = array<i32>} : memref<16x256xf32, #tpu.memory_space<vmem>>, vector<16x256xf32>,
    } else {
    }
    return
  }
  func.func @transform_0(%arg0: i32, %arg1: i32, %arg2: i32) -> (i32, i32) {
    %c0_i32 = arith.constant 0 : i32
    return %arg0, %arg2 : i32, i32
  }
  func.func @transform_1(%arg0: i32, %arg1: i32, %arg2: i32) -> (i32, i32) {
    %c0_i32 = arith.constant 0 : i32
    return %arg2, %arg1 : i32, i32
  }
  func.func @transform_2(%arg0: i32, %arg1: i32, %arg2: i32) -> (i32, i32) {
    %c0_i32 = arith.constant 0 : i32
    %c0_i32_0 = arith.constant 0 : i32
    return %c0_i32, %arg1 : i32, i32
  }
  func.func @transform_3(%arg0: i32, %arg1: i32, %arg2: i32) -> (i32, i32) {
    %c0_i32 = arith.constant 0 : i32
    return %arg0, %arg1 : i32, i32
  }
}

module attributes {stable_mosaic.version = 11 : i64} {
  func.func @_softmax_kernel(%arg0: i32, %arg1: memref<16x256xf32, #tpu.memory_space<vmem>>, %arg2: memref<16x256xf32, #tpu.memory_space<vmem>>) attributes {dimension_semantics = [#tpu.dimension_semantics<parallel>], iteration_bounds = array<i64: 1>, scalar_prefetch = 0 : i64, scratch_operands = 0 : i64, tpu.core_type = #tpu.core_type<tc>, window_params = [{transform_indices = @transform_0, window_bounds = array<i64: 16, 256>}, {transform_indices = @transform_1, window_bounds = array<i64: 16, 256>}]} {
    %c0 = arith.constant 0 : index
    %c0_0 = arith.constant 0 : index
    %0 = vector.load %arg1[%c0, %c0_0] : memref<16x256xf32, #tpu.memory_space<vmem>>, vector<16x256xf32>
    %1 = tpu.iota {dimensions = array<i32: 1>} : vector<16x256xi32>
    %c256_i32 = arith.constant 256 : i32
    %2 = vector.broadcast %c256_i32 : i32 to vector<16x256xi32>
    %3 = arith.cmpi slt, %1, %2 : vector<16x256xi32>
    %cst = arith.constant 0xFF800000 : f32
    %4 = vector.broadcast %cst : f32 to vector<16x256xf32>
    %5 = arith.select %3, %0, %4 : vector<16x256xi1>, vector<16x256xf32>
    %cst_1 = arith.constant dense<0xFF800000> : vector<16xf32>
    %6 = vector.multi_reduction <maximumf>, %5, %cst_1 [1] : vector<16x256xf32> to vector<16xf32>
    %7 = vector.shape_cast %6 : vector<16xf32> to vector<16x1xf32>
    %8 = vector.broadcast %7 : vector<16x1xf32> to vector<16x256xf32>
    %9 = arith.subf %0, %8 : vector<16x256xf32>
    %10 = math.exp %9 : vector<16x256xf32>
    %cst_2 = arith.constant 0.000000e+00 : f32
    %11 = vector.broadcast %cst_2 : f32 to vector<16x256xf32>
    %12 = arith.select %3, %10, %11 : vector<16x256xi1>, vector<16x256xf32>
    %cst_3 = arith.constant dense<0.000000e+00> : vector<16xf32>
    %13 = vector.multi_reduction <add>, %12, %cst_3 [1] : vector<16x256xf32> to vector<16xf32>
    %14 = vector.shape_cast %13 : vector<16xf32> to vector<16x1xf32>
    %15 = vector.broadcast %14 : vector<16x1xf32> to vector<16x256xf32>
    %16 = arith.divf %12, %15 : vector<16x256xf32>
    %c0_4 = arith.constant 0 : index
    %c0_5 = arith.constant 0 : index
    %17 = vector.load %arg2[%c0_4, %c0_5] : memref<16x256xf32, #tpu.memory_space<vmem>>, vector<16x256xf32>
    tpu.vector_store %arg2[%c0_4, %c0_5], %16 {strides = array<i32>} : memref<16x256xf32, #tpu.memory_space<vmem>>, vector<16x256xf32>,
    return
  }
  func.func @transform_0(%arg0: i32) -> (i32, i32) {
    %c0_i32 = arith.constant 0 : i32
    %c0_i32_0 = arith.constant 0 : i32
    return %arg0, %c0_i32 : i32, i32
  }
  func.func @transform_1(%arg0: i32) -> (i32, i32) {
    %c0_i32 = arith.constant 0 : i32
    %c0_i32_0 = arith.constant 0 : i32
    return %arg0, %c0_i32 : i32, i32
  }
}

</mosaic_0001>

<bundles_post_ra>
// kernel: decoder_forward.6
= control target key start
LH: loop header
LB: loop body
LE: loop exit
PB: predicated region body
PF: predicated region fallthrough
CT: control target
= control target key end

     0   :  { %7 = vsyncpa [#allocation4], 0  ;;  %s254_s9 = smov [#allocation3]   ;;  %s296_s0 = inlined_call_operand.vmem [shape: f32[16,128], index: 0, kind: input, shape index: {}]   ;;  %s297_s1 = inlined_call_operand.hbm [shape: f32[128,128], index: 1, kind: input, shape index: {}]   ;;  %s298_s2 = inlined_call_operand.vmem [shape: f32[16,128], index: 2, kind: output, shape index: {}]  }
   0x1   :  { %s15_s10 = sshll.u32 %s254_s9, 4  ;;  %s230_s13 = scalar_lea.hbm %s297_s1, 2048  ;;  %s16_s10 = int_to_ptr.vmem [resolvable:$true] %s15_s10 }
   0x2   :  { %p231_p0 = scmp.ne.s32.totalorder %s297_s1, %s230_s13  ;;  %p234_p1 = scmp.lt.u32.totalorder %s230_s13, %s297_s1 }
   0x4   :  { %p236_p2 = pnand %p234_p1, %p231_p0 }
   0x6   :  { %239 = shalt.err (!%p236_p2)
}
   0x7   :  { %s240_s18 = scalar_lea.vmem %s16_s10, 2048  ;;  %p245_p4 = scmp.lt.s32.totalorder %s16_s10, %s16_s10 }
   0x8   :  { %p241_p3 = scmp.ne.s32.totalorder %s16_s10, %s240_s18  ;;  %p246_p5 = scmp.lt.s32.totalorder %s240_s18, %s240_s18 }
   0xa   :  { %p247_p6 = por %p246_p5, %p245_p4 }
   0xc   :  { %p248_p7 = pnand %p247_p6, %p241_p3 }
   0xe   :  { %251 = shalt.err (!%p248_p7)
}
   0xf   :  { %s255_s19 = smov 128   ;;  %s256_s20 = smov 8  }
  0x10   :  { %21 = dma.hbm_to_vmem [thread:$0]  %s297_s1, 2048, %s16_s10, [#allocation4], %s255_s19, %s255_s19, %s256_s20  }
  0x11   :  { %252 = dma.done.wait [#allocation4], 2048  }
  0x12   :  { %253 = vsyncadd [#allocation4], 4294965248  ;;  %v35_v0 = vld [vmem:[#allocation3] sm:$0xff]  ;;  %v36_v1 = vld [vmem:[#allocation3 + $0x8] sm:$0xff] }
  0x13   :  { %v37_v2 = vld [vmem:[#allocation3 + $0x10] sm:$0xff]  ;;  %v195_v3 = vpack.c.bf16 %v36_v1, %v35_v0  ;;  %v38_v4 = vld [vmem:[#allocation3 + $0x18] sm:$0xff]  ;;  %v39_v6 = vld [vmem:[#allocation3 + $0x20] sm:$0xff] }
  0x14   :  { %v199_v5 = vpack.c.bf16 %v38_v4, %v37_v2  ;;  %v40_v7 = vld [vmem:[#allocation3 + $0x28] sm:$0xff]  ;;  %v33_v9 = vld [vmem:[%s296_s0] sm:$0xff]  ;;  %v41_v10 = vld [vmem:[#allocation3 + $0x30] sm:$0xff] }
  0x15   :  { %196 = vmatprep.subr.bf16.mxu0 %v195_v3  ;;  %v203_v8 = vpack.c.bf16 %v40_v7, %v39_v6  ;;  %v42_v11 = vld [vmem:[#allocation3 + $0x38] sm:$0xff]  ;;  %192 = vmatprep.mubr.f32.mxu0 %v33_v9  ;;  %v43_v13 = vld [vmem:[#allocation3 + $0x40] sm:$0xff]  ;;  %v44_v14 = vld [vmem:[#allocation3 + $0x48] sm:$0xff] }
  0x16   :  { %198 = vmatpush3.bf16.msra.mxu0 %v195_v3  ;;  %v207_v12 = vpack.c.bf16 %v42_v11, %v41_v10  ;;  %v211_v15 = vpack.c.bf16 %v44_v14, %v43_v13  ;;  %v45_v16 = vld [vmem:[#allocation3 + $0x50] sm:$0xff]  ;;  %v46_v17 = vld [vmem:[#allocation3 + $0x58] sm:$0xff]  ;;  %v47_v19 = vld [vmem:[#allocation3 + $0x60] sm:$0xff] }
  0x17   :  { %200 = vmatprep.subr.bf16.mxu0 %v199_v5  ;;  %v215_v18 = vpack.c.bf16 %v46_v17, %v45_v16  ;;  %v48_v20 = vld [vmem:[#allocation3 + $0x68] sm:$0xff]  ;;  %v49_v22 = vld [vmem:[#allocation3 + $0x70] sm:$0xff]  ;;  %v50_v23 = vld [vmem:[#allocation3 + $0x78] sm:$0xff] }
  0x18   :  { %v219_v21 = vpack.c.bf16 %v48_v20, %v47_v19  ;;  %v223_v24 = vpack.c.bf16 %v50_v23, %v49_v22  ;;  %v34_v25 = vld [vmem:[%s296_s0 + $0x8] sm:$0xff] }
  0x1a   :  { %202 = vmatpush3.bf16.msra.mxu0 %v199_v5 }
  0x1b   :  { %204 = vmatprep.subr.bf16.mxu0 %v203_v8 }
  0x1e   :  { %206 = vmatpush3.bf16.msra.mxu0 %v203_v8 }
  0x1f   :  { %208 = vmatprep.subr.bf16.mxu0 %v207_v12 }
  0x22   :  { %210 = vmatpush3.bf16.msra.mxu0 %v207_v12 }
  0x23   :  { %212 = vmatprep.subr.bf16.mxu0 %v211_v15 }
  0x26   :  { %214 = vmatpush3.bf16.msra.mxu0 %v211_v15 }
  0x27   :  { %216 = vmatprep.subr.bf16.mxu0 %v215_v18 }
  0x2a   :  { %218 = vmatpush3.bf16.msra.mxu0 %v215_v18 }
  0x2b   :  { %220 = vmatprep.subr.bf16.mxu0 %v219_v21 }
  0x2e   :  { %222 = vmatpush3.bf16.msra.mxu0 %v219_v21 }
  0x2f   :  { %224 = vmatprep.subr.bf16.mxu0 %v223_v24 }
  0x32   :  { %226 = vmatpush3.bf16.msra.mxu0 %v223_v24 }
  0x35   :  { %193 = vmatmul.mubr.f32.vlgmr.msra.gmra.mrb[0].mxu0 %v34_v25 }
 0x108   :  { %v194_v26 = vpop.f32.mrb[0].mxu0 }
 0x109   :  { %136 = vst [vmem:[%s298_s2 + $0x8] sm:$0xff] %v194_v26  ;;  %v117_v27 = vpop.f32.mrb[1].mxu0 }
 0x10a   :  { %135 = vst [vmem:[%s298_s2] sm:$0xff] %v117_v27 }
 0x10b   :  { %141 = vsyncpa [#allocation4], 1 }

// kernel: decoder_forward.9
= control target key start
LH: loop header
LB: loop body
LE: loop exit
PB: predicated region body
PF: predicated region fallthrough
CT: control target
= control target key end

     0   :  { %s74_s0 = inlined_call_operand.vmem [shape: f32[16,128], index: 0, kind: input, shape index: {}]   ;;  %s75_s1 = inlined_call_operand.vmem [shape: f32[16,128], index: 1, kind: output, shape index: {}]  }
   0x1   :  { %v8_v0 = vld [vmem:[%s74_s0] sm:$0xff]  ;;  %v9_v1 = vld [vmem:[%s74_s0 + $0x8] sm:$0xff] }
   0x2   :  { %15 = vadd.xlane.f32.xlu0 %v8_v0 }
   0x6   :  { %17 = vadd.xlane.f32.xlu0 %v9_v1 }
  0x8f   :  { %v16_v2 = vpop.xlane.xlu0 %15 }
  0x90   :  { %v20_v3 = vmul.f32 0.0078125, %v16_v2 }
  0x92   :  { %v22_v4 = vsub.f32 %v8_v0, %v20_v3 }
  0x93   :  { %v18_v5 = vpop.xlane.xlu0 %17 }
  0x94   :  { %v21_v6 = vmul.f32 0.0078125, %v18_v5  ;;  %v26_v7 = vmul.f32 %v22_v4, %v22_v4 }
  0x96   :  { %v23_v8 = vsub.f32 %v9_v1, %v21_v6  ;;  %28 = vadd.xlane.f32.xlu1 %v26_v7 }
  0x98   :  { %v27_v9 = vmul.f32 %v23_v8, %v23_v8 }
  0x9a   :  { %30 = vadd.xlane.f32.xlu1 %v27_v9 }
 0x123   :  { %v29_v10 = vpop.xlane.xlu1 %28 }
 0x124   :  { %v32_v11 = vmul.f32 0.0078125, %v29_v10 }
 0x126   :  { %v34_v12 = vadd.f32 1e-05, %v32_v11 }
 0x127   :  { %v31_v13 = vpop.xlane.xlu1 %30 }
 0x128   :  { %48 = vrsqrt.f32 %v34_v12  ;;  %v33_v14 = vmul.f32 0.0078125, %v31_v13 }
 0x12a   :  { %v35_v15 = vadd.f32 1e-05, %v33_v14 }
 0x12c   :  { %50 = vrsqrt.f32 %v35_v15 }
 0x132   :  { %v49_v16 = vpop.eup %48 }
 0x133   :  { %v38_v17 = vmul.f32 %v49_v16, %v22_v4 }
 0x135   :  { %v40_v18 = vmax.f32 %v38_v17, 0.0 }
 0x136   :  { %v51_v19 = vpop.eup %50 }
 0x137   :  { %42 = vst [vmem:[%s75_s1] sm:$0xff] %v40_v18  ;;  %v39_v20 = vmul.f32 %v51_v19, %v23_v8 }
 0x139   :  { %v41_v21 = vmax.f32 %v39_v20, 0.0 }
 0x13b   :  { %43 = vst [vmem:[%s75_s1 + $0x8] sm:$0xff] %v41_v21 }

// kernel: decoder_forward.7
= control target key start
LH: loop header
LB: loop body
LE: loop exit
PB: predicated region body
PF: predicated region fallthrough
CT: control target
= control target key end

     0   :  { %v10_v0 = vlaneseq  ;;  %s74_s0 = inlined_call_operand.vmem [shape: f32[16,128], index: 0, kind: input, shape index: {}]   ;;  %s75_s1 = inlined_call_operand.vmem [shape: f32[16,128], index: 1, kind: output, shape index: {}]  }
   0x1   :  { %v8_v1 = vld [vmem:[%s74_s0] sm:$0xff]  ;;  %v9_v3 = vld [vmem:[%s74_s0 + $0x8] sm:$0xff] }
   0x2   :  { %v11_v2 = vand.u32 127, %v10_v0 }
   0x4   :  { %vm12_vm0 = vcmp.lt.s32.totalorder %v11_v2, 64 }
   0x5   :  { %v13_v4 = vsel %vm12_vm0, %v8_v1, 0.0  ;;  %v14_v5 = vsel %vm12_vm0, %v9_v3, 0.0 }
   0x6   :  { %15 = vadd.xlane.f32.xlu0 %v13_v4 }
   0xa   :  { %17 = vadd.xlane.f32.xlu0 %v14_v5 }
  0x93   :  { %v16_v6 = vpop.xlane.xlu0 %15 }
  0x94   :  { %v20_v7 = vmul.f32 0.015625, %v16_v6 }
  0x96   :  { %v22_v8 = vsub.f32 %v8_v1, %v20_v7 }
  0x97   :  { %v18_v9 = vpop.xlane.xlu0 %17 }
  0x98   :  { %v21_v10 = vmul.f32 0.015625, %v18_v9  ;;  %v24_v11 = vsel %vm12_vm0, %v22_v8, 0.0 }
  0x99   :  { %v26_v12 = vmul.f32 %v24_v11, %v24_v11 }
  0x9a   :  { %v23_v13 = vsub.f32 %v9_v3, %v21_v10 }
  0x9b   :  { %28 = vadd.xlane.f32.xlu1 %v26_v12 }
  0x9c   :  { %v25_v14 = vsel %vm12_vm0, %v23_v13, 0.0 }
  0x9d   :  { %v27_v15 = vmul.f32 %v25_v14, %v25_v14 }
  0x9f   :  { %30 = vadd.xlane.f32.xlu1 %v27_v15 }
 0x128   :  { %v29_v16 = vpop.xlane.xlu1 %28 }
 0x129   :  { %v32_v17 = vmul.f32 0.015625, %v29_v16 }
 0x12b   :  { %v34_v18 = vadd.f32 1e-05, %v32_v17 }
 0x12c   :  { %v31_v19 = vpop.xlane.xlu1 %30 }
 0x12d   :  { %48 = vrsqrt.f32 %v34_v18  ;;  %v33_v20 = vmul.f32 0.015625, %v31_v19 }
 0x12f   :  { %v35_v21 = vadd.f32 1e-05, %v33_v20 }
 0x131   :  { %50 = vrsqrt.f32 %v35_v21 }
 0x137   :  { %v49_v22 = vpop.eup %48 }
 0x138   :  { %v38_v23 = vmul.f32 %v49_v22, %v24_v11 }
 0x13a   :  { %v40_v24 = vmax.f32 %v38_v23, 0.0 }
 0x13b   :  { %v51_v25 = vpop.eup %50 }
 0x13c   :  { %42 = vst [vmem:[%s75_s1] sm:$0xff] %v40_v24  ;;  %v39_v26 = vmul.f32 %v51_v25, %v25_v14 }
 0x13e   :  { %v41_v27 = vmax.f32 %v39_v26, 0.0 }
 0x140   :  { %43 = vst [vmem:[%s75_s1 + $0x8] sm:$0xff] %v41_v27 }

// kernel: decoder_forward.11
= control target key start
LH: loop header
LB: loop body
LE: loop exit
PB: predicated region body
PF: predicated region fallthrough
CT: control target
= control target key end

     0   :  { %s152_s0 = inlined_call_operand.vmem [shape: f32[16,256], index: 0, kind: input, shape index: {}]   ;;  %s153_s1 = inlined_call_operand.hbm [shape: f32[16,256], index: 1, kind: output, shape index: {}]  }
   0x1   :  { %v9_v0 = vld [vmem:[%s152_s0] sm:$0xff]  ;;  %v10_v1 = vld [vmem:[%s152_s0 + $0x8] sm:$0xff]  ;;  %v11_v2 = vld [vmem:[%s152_s0 + $0x10] sm:$0xff] }
   0x2   :  { %v22_v3 = vmax.f32 %v9_v0, %v10_v1  ;;  %v12_v4 = vld [vmem:[%s152_s0 + $0x18] sm:$0xff] }
   0x3   :  { %6 = vsyncpa [#allocation3], 0  ;;  %v25_v5 = vmax.f32 %v11_v2, %v12_v4  ;;  %s115_s0 = smov [#allocation2]  }
   0x4   :  { %23 = vmax.xlane.f32.xlu0 %v22_v3  ;;  %s65_s14 = sshll.u32 %s115_s0, 4  ;;  %s66_s14 = int_to_ptr.vmem [resolvable:$true] %s65_s14 }
   0x5   :  { %s91_s15 = scalar_lea.vmem %s66_s14, 512  ;;  %p96_p1 = scmp.lt.s32.totalorder %s66_s14, %s66_s14 }
   0x6   :  { %p92_p0 = scmp.ne.s32.totalorder %s66_s14, %s91_s15  ;;  %p97_p2 = scmp.lt.s32.totalorder %s91_s15, %s91_s15 }
   0x8   :  { %26 = vmax.xlane.f32.xlu0 %v25_v5  ;;  %p98_p3 = por %p97_p2, %p96_p1 }
   0xa   :  { %p99_p4 = pnand %p98_p3, %p92_p0 }
  0x91   :  { %v24_v6 = vpop.xlane.xlu0 %23 }
  0x92   :  { %v28_v7 = vsub.f32 %v9_v0, %v24_v6  ;;  %v29_v8 = vsub.f32 %v10_v1, %v24_v6 }
  0x94   :  { %v32_v9 = vmul.f32 1.442695, %v28_v7  ;;  %v34_v10 = vmul.f32 1.442695, %v29_v8 }
  0x95   :  { %v27_v11 = vpop.xlane.xlu0 %26 }
  0x96   :  { %79 = vpow2.f32 %v32_v9  ;;  %v30_v12 = vsub.f32 %v11_v2, %v27_v11  ;;  %v31_v13 = vsub.f32 %v12_v4, %v27_v11 }
  0x97   :  { %81 = vpow2.f32 %v34_v10 }
  0x98   :  { %v36_v14 = vmul.f32 1.442695, %v30_v12  ;;  %v38_v15 = vmul.f32 1.442695, %v31_v13 }
  0x9a   :  { %83 = vpow2.f32 %v36_v14 }
  0x9b   :  { %85 = vpow2.f32 %v38_v15 }
  0xa0   :  { %v80_v16 = vpop.eup %79 }
  0xa1   :  { %v82_v17 = vpop.eup %81 }
  0xa2   :  { %v44_v18 = vadd.f32 %v82_v17, %v80_v16 }
  0xa4   :  { %v84_v19 = vpop.eup %83  ;;  %45 = vadd.xlane.f32.xlu1 %v44_v18 }
  0xa5   :  { %v86_v20 = vpop.eup %85 }
  0xa6   :  { %v47_v21 = vadd.f32 %v86_v20, %v84_v19 }
  0xa8   :  { %48 = vadd.xlane.f32.xlu1 %v47_v21 }
 0x131   :  { %v46_v22 = vpop.xlane.xlu1 %45 }
 0x132   :  { %87 = vrcp.f32 %v46_v22 }
 0x135   :  { %v49_v23 = vpop.xlane.xlu1 %48 }
 0x136   :  { %89 = vrcp.f32 %v49_v23 }
 0x13c   :  { %v88_v24 = vpop.eup %87 }
 0x13d   :  { %v51_v25 = vmul.f32 %v88_v24, %v80_v16  ;;  %v52_v26 = vmul.f32 %v88_v24, %v82_v17 }
 0x13f   :  { %56 = vst [vmem:[#allocation2] sm:$0xff] %v51_v25  ;;  %57 = vst [vmem:[#allocation2 + $0x8] sm:$0xff] %v52_v26 }
 0x140   :  { %v90_v27 = vpop.eup %89 }
 0x141   :  { %v54_v28 = vmul.f32 %v90_v27, %v84_v19  ;;  %v55_v29 = vmul.f32 %v90_v27, %v86_v20 }
 0x143   :  { %58 = vst [vmem:[#allocation2 + $0x10] sm:$0xff] %v54_v28  ;;  %59 = vst [vmem:[#allocation2 + $0x18] sm:$0xff] %v55_v29 }
 0x144   :  { %102 = shalt.err (!%p99_p4)
}
 0x145   :  { %s103_s18 = scalar_lea.hbm %s153_s1, 512 }
 0x146   :  { %p104_p5 = scmp.ne.s32.totalorder %s153_s1, %s103_s18  ;;  %p107_p6 = scmp.lt.u32.totalorder %s103_s18, %s153_s1 }
 0x148   :  { %p109_p7 = pnand %p107_p6, %p104_p5 }
 0x14a   :  { %112 = shalt.err (!%p109_p7)
}
 0x14b   :  { %s116_s23 = smov 256   ;;  %s117_s24 = smov 16  }
 0x14c   :  { %71 = dma.vmem_to_hbm [thread:$0]  %s66_s14, 512, %s153_s1, [#allocation3], %s116_s23, %s116_s23, %s117_s24  }
 0x14d   :  { %113 = dma.done.wait [#allocation3], 512  }
 0x14e   :  { %114 = vsyncadd [#allocation3], 4294966784 }
 0x14f   :  { %75 = vsyncpa [#allocation3], 1 }

// kernel: decoder_forward.10
= control target key start
LH: loop header
LB: loop body
LE: loop exit
PB: predicated region body
PF: predicated region fallthrough
CT: control target
= control target key end

     0   :  { %v225_v3 = vmov 0.0   ;;  %v154_v51 = vlaneseq  ;;  %s363_s1 = inlined_call_operand.vmem [shape: f32[128,256], index: 1, kind: input, shape index: {}]   ;;  %s364_s0 = inlined_call_operand.vmem [shape: f32[16,128], index: 0, kind: input, shape index: {}]   ;;  %s365_s2 = inlined_call_operand.vmem [shape: f32[1,256], index: 2, kind: input, shape index: {}]   ;;  %s366_s3 = inlined_call_operand.vmem [shape: f32[16,256], index: 3, kind: output, shape index: {}]  }
   0x1   :  { %v29_v0 = vld [vmem:[%s363_s1 + $0x8] sm:$0xff]  ;;  %v31_v1 = vld [vmem:[%s363_s1 + $0x18] sm:$0xff]  ;;  %v28_v2 = vld [vmem:[%s363_s1] sm:$0xff]  ;;  %124 = vmatprep.mubr.f32.mxu0 %v225_v3  ;;  %130 = vmatprep.mubr.f32.mxu1 %v225_v3 }
   0x2   :  { %v176_v4 = vpack.c.bf16 %v31_v1, %v29_v0  ;;  %v30_v5 = vld [vmem:[%s363_s1 + $0x10] sm:$0xff]  ;;  %v33_v6 = vld [vmem:[%s363_s1 + $0x28] sm:$0xff]  ;;  %v35_v7 = vld [vmem:[%s363_s1 + $0x38] sm:$0xff]  ;;  %v155_v52 = vshrl.u32 %v154_v51, 7 }
   0x3   :  { %v178_v8 = vpack.c.bf16 %v30_v5, %v28_v2  ;;  %v180_v9 = vpack.c.bf16 %v35_v7, %v33_v6  ;;  %v32_v10 = vld [vmem:[%s363_s1 + $0x20] sm:$0xff]  ;;  %v34_v11 = vld [vmem:[%s363_s1 + $0x30] sm:$0xff]  ;;  %v37_v12 = vld [vmem:[%s363_s1 + $0x48] sm:$0xff] }
   0x4   :  { %177 = vmatprep.subr.bf16.mxu0 %v176_v4  ;;  %208 = vmatprep.subr.bf16.mxu1 %v176_v4  ;;  %v39_v13 = vld [vmem:[%s363_s1 + $0x58] sm:$0xff]  ;;  %v182_v14 = vpack.c.bf16 %v34_v11, %v32_v10  ;;  %v36_v16 = vld [vmem:[%s363_s1 + $0x40] sm:$0xff]  ;;  %v38_v17 = vld [vmem:[%s363_s1 + $0x50] sm:$0xff]  ;;  %v156_v53 = vsub.s32 0, %v155_v52  ;;  %v160_v55 = vsub.s32 1, %v155_v52 }
   0x5   :  { %179 = vmatpush1.bf16.msra.mxu0 %v178_v8  ;;  %216 = vmatpush1.bf16.msra.mxu1 %v178_v8  ;;  %v184_v15 = vpack.c.bf16 %v39_v13, %v37_v12  ;;  %v41_v18 = vld [vmem:[%s363_s1 + $0x68] sm:$0xff]  ;;  %v43_v19 = vld [vmem:[%s363_s1 + $0x78] sm:$0xff]  ;;  %v186_v20 = vpack.c.bf16 %v38_v17, %v36_v16  ;;  %v40_v22 = vld [vmem:[%s363_s1 + $0x60] sm:$0xff] }
   0x6   :  { %181 = vmatprep.subr.bf16.mxu0 %v180_v9  ;;  %209 = vmatprep.subr.bf16.mxu1 %v180_v9  ;;  %v188_v21 = vpack.c.bf16 %v43_v19, %v41_v18  ;;  %v42_v23 = vld [vmem:[%s363_s1 + $0x70] sm:$0xff]  ;;  %v45_v24 = vld [vmem:[%s363_s1 + $0x88] sm:$0xff]  ;;  %v47_v25 = vld [vmem:[%s363_s1 + $0x98] sm:$0xff] }
   0x7   :  { %v190_v26 = vpack.c.bf16 %v42_v23, %v40_v22  ;;  %v192_v27 = vpack.c.bf16 %v47_v25, %v45_v24  ;;  %v44_v28 = vld [vmem:[%s363_s1 + $0x80] sm:$0xff]  ;;  %v46_v29 = vld [vmem:[%s363_s1 + $0x90] sm:$0xff]  ;;  %v49_v30 = vld [vmem:[%s363_s1 + $0xa8] sm:$0xff] }
   0x8   :  { %v51_v31 = vld [vmem:[%s363_s1 + $0xb8] sm:$0xff]  ;;  %v194_v32 = vpack.c.bf16 %v46_v29, %v44_v28  ;;  %v48_v34 = vld [vmem:[%s363_s1 + $0xa0] sm:$0xff]  ;;  %v50_v35 = vld [vmem:[%s363_s1 + $0xb0] sm:$0xff] }
   0x9   :  { %183 = vmatpush1.bf16.msra.mxu0 %v182_v14  ;;  %217 = vmatpush1.bf16.msra.mxu1 %v182_v14  ;;  %v196_v33 = vpack.c.bf16 %v51_v31, %v49_v30  ;;  %v53_v36 = vld [vmem:[%s363_s1 + $0xc8] sm:$0xff]  ;;  %v55_v37 = vld [vmem:[%s363_s1 + $0xd8] sm:$0xff]  ;;  %v198_v38 = vpack.c.bf16 %v50_v35, %v48_v34  ;;  %v52_v40 = vld [vmem:[%s363_s1 + $0xc0] sm:$0xff] }
   0xa   :  { %185 = vmatprep.subr.bf16.mxu0 %v184_v15  ;;  %210 = vmatprep.subr.bf16.mxu1 %v184_v15  ;;  %v200_v39 = vpack.c.bf16 %v55_v37, %v53_v36  ;;  %v54_v41 = vld [vmem:[%s363_s1 + $0xd0] sm:$0xff]  ;;  %v57_v42 = vld [vmem:[%s363_s1 + $0xe8] sm:$0xff]  ;;  %v59_v43 = vld [vmem:[%s363_s1 + $0xf8] sm:$0xff] }
   0xb   :  { %v202_v44 = vpack.c.bf16 %v54_v41, %v52_v40  ;;  %v204_v45 = vpack.c.bf16 %v59_v43, %v57_v42  ;;  %v56_v46 = vld [vmem:[%s363_s1 + $0xe0] sm:$0xff]  ;;  %v58_v47 = vld [vmem:[%s363_s1 + $0xf0] sm:$0xff]  ;;  %v27_v50 = vld [vmem:[%s364_s0 + $0x8] sm:$0xff] }
   0xc   :  { %v206_v48 = vpack.c.bf16 %v58_v47, %v56_v46  ;;  %v26_v49 = vld [vmem:[%s364_s0] sm:$0xff] }
   0xd   :  { %187 = vmatpush1.bf16.msra.mxu0 %v186_v20  ;;  %218 = vmatpush1.bf16.msra.mxu1 %v186_v20  ;;  %v152_v54 = vld [vmem:[%s365_s2] sm:$0x3] }
   0xe   :  { %189 = vmatprep.subr.bf16.mxu0 %v188_v21  ;;  %211 = vmatprep.subr.bf16.mxu1 %v188_v21  ;;  %v157_v56 = vrot.slane %v152_v54, %v156_v53  ;;  %v161_v57 = vrot.slane %v152_v54, %v160_v55 }
  0x11   :  { %191 = vmatpush1.bf16.msra.mxu0 %v190_v26  ;;  %219 = vmatpush1.bf16.msra.mxu1 %v190_v26 }
  0x12   :  { %193 = vmatprep.subr.bf16.mxu0 %v192_v27  ;;  %212 = vmatprep.subr.bf16.mxu1 %v192_v27 }
  0x15   :  { %195 = vmatpush1.bf16.msra.mxu0 %v194_v32  ;;  %220 = vmatpush1.bf16.msra.mxu1 %v194_v32 }
  0x16   :  { %197 = vmatprep.subr.bf16.mxu0 %v196_v33  ;;  %213 = vmatprep.subr.bf16.mxu1 %v196_v33 }
  0x19   :  { %199 = vmatpush1.bf16.msra.mxu0 %v198_v38  ;;  %221 = vmatpush1.bf16.msra.mxu1 %v198_v38 }
  0x1a   :  { %201 = vmatprep.subr.bf16.mxu0 %v200_v39  ;;  %214 = vmatprep.subr.bf16.mxu1 %v200_v39 }
  0x1d   :  { %203 = vmatpush1.bf16.msra.mxu0 %v202_v44  ;;  %222 = vmatpush1.bf16.msra.mxu1 %v202_v44 }
  0x1e   :  { %205 = vmatprep.subr.bf16.mxu0 %v204_v45  ;;  %215 = vmatprep.subr.bf16.mxu1 %v204_v45 }
  0x21   :  { %207 = vmatpush1.bf16.msra.mxu0 %v206_v48  ;;  %223 = vmatpush1.bf16.msra.mxu1 %v206_v48 }
  0x24   :  { %125 = vmatmul.mubr.f32.vlgmr.msra.gmra.mrb[0].mxu0 %v26_v49  ;;  %131 = vmatmul.mubr.f32.vlgmr.msra.gmra.mrb[0].mxu1 %v27_v50 }
  0xf7   :  { %v126_v58 = vpop.f32.mrb[0].mxu0  ;;  %v132_v59 = vpop.f32.mrb[0].mxu1 }
  0xf8   :  { %v164_v60 = vadd.f32 %v157_v56, %v126_v58  ;;  %v166_v61 = vadd.f32 %v157_v56, %v132_v59  ;;  %v128_v62 = vpop.f32.mrb[1].mxu0  ;;  %v134_v63 = vpop.f32.mrb[1].mxu1 }
  0xf9   :  { %v165_v0 = vadd.f32 %v161_v57, %v128_v62  ;;  %v167_v1 = vadd.f32 %v161_v57, %v134_v63 }
  0xfa   :  { %168 = vst [vmem:[%s366_s3] sm:$0xff] %v164_v60  ;;  %170 = vst [vmem:[%s366_s3 + $0x10] sm:$0xff] %v166_v61 }
  0xfb   :  { %169 = vst [vmem:[%s366_s3 + $0x8] sm:$0xff] %v165_v0  ;;  %171 = vst [vmem:[%s366_s3 + $0x18] sm:$0xff] %v167_v1 }

</bundles_post_ra>
